<compile_context>
chip_gen: v5e
topology: v5e:2x2
jax: 0.10.0
libtpu: 0.0.40
codegen_flags: <defaults>
</compile_context>

<pallas_src>
import functools

import jax
import jax.numpy as jnp
from jax.experimental import pallas as pl
from jax.experimental.pallas import tpu as pltpu


def _round_up(n, m):
    return ((n + m - 1) // m) * m


def _attention_block(x_ref, w1_ref, b1_ref, w2_ref, b2_ref, s_valid):
    """Returns (pooled (Bt, Hp) f32, softmax weights (Bt, Sp) f32)."""
    Bt, Sp, Hp = x_ref.shape
    Kp = w1_ref.shape[1]                      # projection width, padded to 128

    x = x_ref[...]                            # (Bt, Sp, Hp), bf16 or f32
    # Layout-free flatten: Sp % 8 == 0 and Hp % 128 == 0 are guaranteed by the
    # wrapper, so this reshape does not materialize a VMEM relayout copy.
    x2 = x.reshape(Bt * Sp, Hp)

    # Linear(H, 64) (padded to 128 lanes) + ReLU: one dense MXU matmul with
    # f32 accumulation.  Padded H rows / K columns are zero so they are inert.
    h = jnp.dot(x2, w1_ref[...], preferred_element_type=jnp.float32)
    h = jnp.maximum(h + b1_ref[...], 0.0)     # (Bt*Sp, Kp) f32

    # Linear(64, 1): the N=1 matmul is just a VPU multiply + lane reduction
    # against w2 broadcast as a 128-lane row.
    h3 = h.reshape(Bt, Sp, Kp)
    logits = jnp.sum(h3 * w2_ref[...], axis=-1) + b2_ref[...]   # (Bt, Sp)
    # (b2 mathematically cancels in the softmax; kept for faithfulness, cheap.)

    # Mask padded sequence positions (static predicate), softmax along lanes.
    if s_valid < Sp:
        col = jax.lax.broadcasted_iota(jnp.int32, (Bt, Sp), 1)
        logits = jnp.where(col < s_valid, logits, -1e30)
    m = jnp.max(logits, axis=-1, keepdims=True)
    e = jnp.exp(logits - m)
    w = e / jnp.sum(e, axis=-1, keepdims=True)   # exact divide (free: mem-bound)

    # Weighted sum over the sequence: VPU multiply + sublane (XLU) reduction,
    # f32 math.  Linear in Bt, keeps the MXU free for the first Linear.
    out = jnp.sum(x.astype(jnp.float32) * w[:, :, None], axis=1)  # (Bt, Hp)
    return out, w


def _kernel_with_attn(x_ref, w1_ref, b1_ref, w2_ref, b2_ref,
                      out_ref, attw_ref, *, s_valid):
    out, w = _attention_block(x_ref, w1_ref, b1_ref, w2_ref, b2_ref, s_valid)
    out_ref[...] = out.astype(out_ref.dtype)
    attw_ref[...] = w.astype(attw_ref.dtype)


def _kernel_no_attn(x_ref, w1_ref, b1_ref, w2_ref, b2_ref, out_ref, *, s_valid):
    out, _ = _attention_block(x_ref, w1_ref, b1_ref, w2_ref, b2_ref, s_valid)
    out_ref[...] = out.astype(out_ref.dtype)


def self_attention_layer(x, w1, b1, w2, b2, return_attention=False,
                         input_dtype=jnp.bfloat16, target_tile_bytes=2 << 20):
    """x: (B, S, H).  w1: (H, 64), b1: (64,), w2: (64, 1), b2: (1,).

    Weights are stored (in, out), i.e. transposed from nn.Linear.
    """
    B, S, H = x.shape
    K = w1.shape[1]

    # Padding targets: layout-free reshapes and full-lane vregs.
    Sp = _round_up(S, 8)
    Hp = _round_up(H, 128)
    Kp = _round_up(K, 128)

    itemsize = jnp.dtype(input_dtype).itemsize

    # Batch block: amortize per-grid-step pipeline overhead by streaming
    # ~target_tile_bytes of x per step.  Keep Bt a multiple of 8 (sublane
    # alignment for the (Bt,Hp)/(Bt,Sp) output stores) and, when the batch is
    # large enough, keep >= 2 grid steps so the "parallel" batch axis can be
    # sharded across v7x's two TensorCores.
    bytes_per_row = Sp * Hp * itemsize
    Bt = max(8, (target_tile_bytes // bytes_per_row) // 8 * 8)
    Bt = min(Bt, _round_up(B, 8))
    if B > 8 and pl.cdiv(B, Bt) < 2:
        Bt = max(8, _round_up(pl.cdiv(B, 2), 8))
    Bp = pl.cdiv(B, Bt) * Bt

    # Zero-padded, casted operands.  Padded H columns / K columns are zero so
    # they contribute nothing; padded seq positions are masked in-kernel;
    # padded batch rows are sliced off at the end.
    xp = jnp.pad(x, ((0, Bp - B), (0, Sp - S), (0, Hp - H))).astype(input_dtype)
    w1p = jnp.pad(w1, ((0, Hp - H), (0, Kp - K))).astype(input_dtype)
    b1p = jnp.pad(b1.reshape(1, K), ((0, 0), (0, Kp - K))).astype(jnp.float32)
    w2p = jnp.pad(w2.reshape(1, K), ((0, 0), (0, Kp - K))).astype(jnp.float32)
    b2p = b2.reshape(1, 1).astype(jnp.float32)

    grid = (Bp // Bt,)
    in_specs = [
        pl.BlockSpec((Bt, Sp, Hp), lambda i: (i, 0, 0)),   # streamed x tile
        pl.BlockSpec((Hp, Kp), lambda i: (0, 0)),          # W1 (resident)
        pl.BlockSpec((1, Kp), lambda i: (0, 0)),           # b1
        pl.BlockSpec((1, Kp), lambda i: (0, 0)),           # w2 as a lane row
        pl.BlockSpec((1, 1), lambda i: (0, 0)),            # b2
    ]
    # TODO(synk): if an xprof trace still shows exposed DMA on x at large Bt,
    # add pipeline_mode=pl.Buffered(3) to in_specs[0] only (costs one extra
    # x tile of VMEM - re-check the v7x 64 MiB budget).

    cost = pl.CostEstimate(
        flops=(2 * Bp * Sp * Hp * Kp          # first Linear (MXU)
               + 2 * Bp * Sp * Kp             # logit lane-reduction (VPU)
               + 2 * Bp * Sp * Hp),           # weighted sum (VPU/XLU)
        transcendentals=Bp * Sp,
        bytes_accessed=(itemsize * (Bp * Sp * Hp + Hp * Kp)
                        + 4 * (2 * Kp + 1)
                        + 4 * Bp * Hp
                        + (4 * Bp * Sp if return_attention else 0)),
    )
    # Rough working set: double-buffered x tile + f32 intermediates + weights.
    vmem_need = (2 * Bt * Sp * Hp * itemsize          # x double buffer
                 + 5 * Bt * Sp * Hp * 4               # f32 intermediates
                 + Hp * Kp * itemsize                 # W1
                 + 4 * Bt * (Hp + Sp) * 2             # output double buffers
                 + (4 << 20))                         # headroom
    cparams = pltpu.CompilerParams(
        dimension_semantics=("parallel",),
        vmem_limit_bytes=int(min(max(vmem_need, 32 << 20), 48 << 20)),
    )

    if return_attention:
        kernel = functools.partial(_kernel_with_attn, s_valid=S)
        out, attw = pl.pallas_call(
            kernel,
            out_shape=(jax.ShapeDtypeStruct((Bp, Hp), jnp.float32),
                       jax.ShapeDtypeStruct((Bp, Sp), jnp.float32)),
            grid_spec=pltpu.PrefetchScalarGridSpec(
                num_scalar_prefetch=0, grid=grid, in_specs=in_specs,
                out_specs=[pl.BlockSpec((Bt, Hp), lambda i: (i, 0)),
                           pl.BlockSpec((Bt, Sp), lambda i: (i, 0))]),
            compiler_params=cparams,
            cost_estimate=cost,
        )(xp, w1p, b1p, w2p, b2p)
        return out[:B, :H], attw[:B, :S]

    kernel = functools.partial(_kernel_no_attn, s_valid=S)
    out = pl.pallas_call(
        kernel,
        out_shape=jax.ShapeDtypeStruct((Bp, Hp), jnp.float32),
        grid_spec=pltpu.PrefetchScalarGridSpec(
            num_scalar_prefetch=0, grid=grid, in_specs=in_specs,
            out_specs=pl.BlockSpec((Bt, Hp), lambda i: (i, 0))),
        compiler_params=cparams,
        cost_estimate=cost,
    )(xp, w1p, b1p, w2p, b2p)
    return out[:B, :H]


def _reference(x, w1, b1, w2, b2):
    # Pure-JAX (f32) reference of the PyTorch forward.
    h = jnp.maximum(jnp.einsum("bsh,hk->bsk", x, w1) + b1, 0.0)
    a = jnp.einsum("bsk,ko->bso", h, w2) + b2            # (B, S, 1)
    w = jax.nn.softmax(a[..., 0], axis=1)                # (B, S)
    return jnp.sum(x * w[..., None], axis=1), w          # (B, H), (B, S)


if __name__ == "__main__":
    # Small shapes: batch=12 (exercises padding to 16 and a 2-step grid),
    # seq=8, nhid=128.
    B, S, H = 12, 8, 128

    key = jax.random.PRNGKey(0)
    kx, kw1, kb1, kw2, kb2 = jax.random.split(key, 5)

    x = jax.random.normal(kx, (B, S, H), dtype=jnp.float32)
    # Parameters per nn.Linear(nhid, 64) / nn.Linear(64, 1), stored (in, out).
    w1 = jax.random.normal(kw1, (H, 64), dtype=jnp.float32) * 0.1
    b1 = jax.random.normal(kb1, (64,), dtype=jnp.float32) * 0.1
    w2 = jax.random.normal(kw2, (64, 1), dtype=jnp.float32) * 0.1
    b2 = jax.random.normal(kb2, (1,), dtype=jnp.float32) * 0.1

    out, weights = self_attention_layer(x, w1, b1, w2, b2, return_attention=True)
    out = jax.block_until_ready(out)
    weights = jax.block_until_ready(weights)
    out_only = jax.block_until_ready(self_attention_layer(x, w1, b1, w2, b2))

    ref_out, ref_w = _reference(x, w1, b1, w2, b2)

    assert out.shape == (B, H) and weights.shape == (B, S)
    # bf16 x / W1 cast -> ~1e-2-level relative error vs the f32 reference.
    assert jnp.allclose(out, ref_out, atol=3e-2, rtol=3e-2), "output mismatch (bf16 path)"
    assert jnp.allclose(weights, ref_w, atol=3e-2, rtol=3e-2), "weights mismatch (bf16 path)"
    assert jnp.allclose(out_only, out, atol=1e-6, rtol=1e-6), "variant mismatch"
    assert jnp.allclose(jnp.sum(weights, axis=1), 1.0, atol=1e-3), "softmax not normalized"

    # Exact-precision path (input_dtype=float32) should match tightly.
    out32, w32 = self_attention_layer(x, w1, b1, w2, b2, return_attention=True,
                                      input_dtype=jnp.float32)
    out32 = jax.block_until_ready(out32)
    w32 = jax.block_until_ready(w32)
    assert jnp.allclose(out32, ref_out, atol=1e-4, rtol=1e-4), "output mismatch (f32 path)"
    assert jnp.allclose(w32, ref_w, atol=1e-4, rtol=1e-4), "weights mismatch (f32 path)"

    print("KERNEL_OK")
</pallas_src>

<mosaic_0001>
module attributes {stable_mosaic.version = 11 : i64} {
  func.func @_kernel_with_attn(%arg0: i32, %arg1: memref<8x8x128xbf16, #tpu.memory_space<vmem>>, %arg2: memref<128x128xbf16, #tpu.memory_space<vmem>>, %arg3: memref<1x128xf32, #tpu.memory_space<vmem>>, %arg4: memref<1x128xf32, #tpu.memory_space<vmem>>, %arg5: memref<1x1xf32, #tpu.memory_space<vmem>>, %arg6: memref<8x128xf32, #tpu.memory_space<vmem>>, %arg7: memref<8x8xf32, #tpu.memory_space<vmem>>) attributes {dimension_semantics = [#tpu.dimension_semantics<parallel>], iteration_bounds = array<i64: 2>, scalar_prefetch = 0 : i64, scratch_operands = 0 : i64, tpu.core_type = #tpu.core_type<tc>, window_params = [{transform_indices = @transform_0, window_bounds = array<i64: 8, 8, 128>}, {pipeline_mode = #tpu.pipeline_mode<synchronous>, transform_indices = @transform_1, window_bounds = array<i64: 128, 128>}, {pipeline_mode = #tpu.pipeline_mode<synchronous>, transform_indices = @transform_2, window_bounds = array<i64: 1, 128>}, {pipeline_mode = #tpu.pipeline_mode<synchronous>, transform_indices = @transform_3, window_bounds = array<i64: 1, 128>}, {pipeline_mode = #tpu.pipeline_mode<synchronous>, transform_indices = @transform_4, window_bounds = array<i64: 1, 1>}, {transform_indices = @transform_5, window_bounds = array<i64: 8, 128>}, {transform_indices = @transform_6, window_bounds = array<i64: 8, 8>}]} {
    %c0 = arith.constant 0 : index
    %c0_0 = arith.constant 0 : index
    %c0_1 = arith.constant 0 : index
    %0 = vector.load %arg1[%c0, %c0_0, %c0_1] : memref<8x8x128xbf16, #tpu.memory_space<vmem>>, vector<8x8x128xbf16>
    %1 = vector.shape_cast %0 : vector<8x8x128xbf16> to vector<64x128xbf16>
    %c0_2 = arith.constant 0 : index
    %c0_3 = arith.constant 0 : index
    %2 = vector.load %arg2[%c0_2, %c0_3] : memref<128x128xbf16, #tpu.memory_space<vmem>>, vector<128x128xbf16>
    %cst = arith.constant dense<0.000000e+00> : vector<64x128xf32>
    %3 = tpu.matmul %1, %2, %cst {dimension_numbers = #tpu.dot_dimension_numbers<[1], [0], [0], [1], [0, 0, 1, 1], [], []>} : vector<64x128xbf16>, vector<128x128xbf16>, vector<64x128xf32> -> vector<64x128xf32>
    %c0_4 = arith.constant 0 : index
    %c0_5 = arith.constant 0 : index
    %4 = vector.load %arg3[%c0_4, %c0_5] : memref<1x128xf32, #tpu.memory_space<vmem>>, vector<1x128xf32>
    %5 = vector.broadcast %4 : vector<1x128xf32> to vector<64x128xf32>
    %6 = arith.addf %3, %5 : vector<64x128xf32>
    %cst_6 = arith.constant 0.000000e+00 : f32
    %7 = vector.broadcast %cst_6 : f32 to vector<64x128xf32>
    %8 = arith.maximumf %6, %7 : vector<64x128xf32>
    %9 = vector.shape_cast %8 : vector<64x128xf32> to vector<8x8x128xf32>
    %c0_7 = arith.constant 0 : index
    %c0_8 = arith.constant 0 : index
    %10 = vector.load %arg4[%c0_7, %c0_8] : memref<1x128xf32, #tpu.memory_space<vmem>>, vector<1x128xf32>
    %11 = vector.shape_cast %10 : vector<1x128xf32> to vector<1x1x128xf32>
    %12 = vector.broadcast %11 : vector<1x1x128xf32> to vector<8x8x128xf32>
    %13 = arith.mulf %9, %12 : vector<8x8x128xf32>
    %cst_9 = arith.constant dense<0.000000e+00> : vector<8x8xf32>
    %14 = vector.multi_reduction <add>, %13, %cst_9 [2] : vector<8x8x128xf32> to vector<8x8xf32>
    %c0_10 = arith.constant 0 : index
    %c0_11 = arith.constant 0 : index
    %15 = vector.load %arg5[%c0_10, %c0_11] : memref<1x1xf32, #tpu.memory_space<vmem>>, vector<1x1xf32>
    %16 = vector.broadcast %15 : vector<1x1xf32> to vector<8x8xf32>
    %17 = arith.addf %14, %16 : vector<8x8xf32>
    %cst_12 = arith.constant dense<0xFF800000> : vector<8xf32>
    %18 = vector.multi_reduction <maximumf>, %17, %cst_12 [1] : vector<8x8xf32> to vector<8xf32>
    %19 = vector.shape_cast %18 : vector<8xf32> to vector<8x1xf32>
    %20 = vector.broadcast %19 : vector<8x1xf32> to vector<8x8xf32>
    %21 = arith.subf %17, %20 : vector<8x8xf32>
    %22 = math.exp %21 : vector<8x8xf32>
    %cst_13 = arith.constant dense<0.000000e+00> : vector<8xf32>
    %23 = vector.multi_reduction <add>, %22, %cst_13 [1] : vector<8x8xf32> to vector<8xf32>
    %24 = vector.shape_cast %23 : vector<8xf32> to vector<8x1xf32>
    %25 = vector.broadcast %24 : vector<8x1xf32> to vector<8x8xf32>
    %26 = arith.divf %22, %25 : vector<8x8xf32>
    %27 = arith.extf %0 : vector<8x8x128xbf16> to vector<8x8x128xf32>
    %28 = vector.shape_cast %26 : vector<8x8xf32> to vector<8x8x1xf32>
    %29 = vector.broadcast %28 : vector<8x8x1xf32> to vector<8x8x128xf32>
    %30 = arith.mulf %27, %29 : vector<8x8x128xf32>
    %cst_14 = arith.constant dense<0.000000e+00> : vector<8x128xf32>
    %31 = vector.multi_reduction <add>, %30, %cst_14 [1] : vector<8x8x128xf32> to vector<8x128xf32>
    %c0_15 = arith.constant 0 : index
    %c0_16 = arith.constant 0 : index
    %32 = vector.load %arg6[%c0_15, %c0_16] : memref<8x128xf32, #tpu.memory_space<vmem>>, vector<8x128xf32>
    tpu.vector_store %arg6[%c0_15, %c0_16], %31 {strides = array<i32>} : memref<8x128xf32, #tpu.memory_space<vmem>>, vector<8x128xf32>,
    %c0_17 = arith.constant 0 : index
    %c0_18 = arith.constant 0 : index
    %33 = vector.load %arg7[%c0_17, %c0_18] : memref<8x8xf32, #tpu.memory_space<vmem>>, vector<8x8xf32>
    tpu.vector_store %arg7[%c0_17, %c0_18], %26 {strides = array<i32>} : memref<8x8xf32, #tpu.memory_space<vmem>>, vector<8x8xf32>,
    return
  }
  func.func @transform_0(%arg0: i32) -> (i32, i32, i32) {
    %c0_i32 = arith.constant 0 : i32
    %c0_i32_0 = arith.constant 0 : i32
    %c0_i32_1 = arith.constant 0 : i32
    return %arg0, %c0_i32, %c0_i32_0 : i32, i32, i32
  }
  func.func @transform_1(%arg0: i32) -> (i32, i32) {
    %c0_i32 = arith.constant 0 : i32
    %c0_i32_0 = arith.constant 0 : i32
    %c0_i32_1 = arith.constant 0 : i32
    return %c0_i32, %c0_i32_0 : i32, i32
  }
  func.func @transform_2(%arg0: i32) -> (i32, i32) {
    %c0_i32 = arith.constant 0 : i32
    %c0_i32_0 = arith.constant 0 : i32
    %c0_i32_1 = arith.constant 0 : i32
    return %c0_i32, %c0_i32_0 : i32, i32
  }
  func.func @transform_3(%arg0: i32) -> (i32, i32) {
    %c0_i32 = arith.constant 0 : i32
    %c0_i32_0 = arith.constant 0 : i32
    %c0_i32_1 = arith.constant 0 : i32
    return %c0_i32, %c0_i32_0 : i32, i32
  }
  func.func @transform_4(%arg0: i32) -> (i32, i32) {
    %c0_i32 = arith.constant 0 : i32
    %c0_i32_0 = arith.constant 0 : i32
    %c0_i32_1 = arith.constant 0 : i32
    return %c0_i32, %c0_i32_0 : i32, i32
  }
  func.func @transform_5(%arg0: i32) -> (i32, i32) {
    %c0_i32 = arith.constant 0 : i32
    %c0_i32_0 = arith.constant 0 : i32
    return %arg0, %c0_i32 : i32, i32
  }
  func.func @transform_6(%arg0: i32) -> (i32, i32) {
    %c0_i32 = arith.constant 0 : i32
    %c0_i32_0 = arith.constant 0 : i32
    return %arg0, %c0_i32 : i32, i32
  }
}

</mosaic_0001>

<bundles_post_ra>
// kernel: tpu_custom_call.1
= control target key start
LH: loop header
LB: loop body
LE: loop exit
PB: predicated region body
PF: predicated region fallthrough
CT: control target
= control target key end

     0   :  { %s1751_s0 = inlined_call_operand.hbm [shape: bf16[16,8,128], index: 0, kind: input, shape index: {}]   ;;  %s1752_s1 = inlined_call_operand.hbm [shape: bf16[128,128], index: 1, kind: input, shape index: {}]   ;;  %s1753_s2 = inlined_call_operand.vmem [shape: f32[1,128], index: 2, kind: input, shape index: {}]   ;;  %s1754_s3 = inlined_call_operand.vmem [shape: f32[1,128], index: 3, kind: input, shape index: {}]   ;;  %s1755_s4 = inlined_call_operand.<no memory space> [shape: f32[1,1], index: 4, kind: input, shape index: {}]   ;;  %s1756_s5 = inlined_call_operand.hbm [shape: f32[16,128], index: 5, kind: output, shape index: {0}]   ;;  %s1757_s6 = inlined_call_operand.vmem [shape: f32[16,8], index: 6, kind: output, shape index: {1}]  }
   0x1   :  { %v12_v0 = vstv %s1755_s4 }
   0x2   :  { %13 = vst [vmem:[#allocation2] sm:$0x1] %v12_v0 }
   0x3   :  { %14 = vsyncpa [#allocation4], 0 }
   0x4   :  { %16 = vsyncpa [#allocation4 + $0x1], 0 }
   0x5   :  { %17 = vsyncpa [#allocation7], 0 }
   0x6   :  { %18 = vsyncpa [#allocation5], 0 }
   0x7   :  { %20 = vsyncpa [#allocation5 + $0x1], 0  ;;  %s1387_s23 = smov 0   ;;  %s1389_s24 = smov 0  }
   0x8   :  { %s1391_s25 = smov 0   ;;  %s1393_s26 = smov 0  }
   0x9 LB: > { %s1408_s4 = sadd.s32 4294967295, %s1343_s26   ;;  %s1014_s27 = sadd.s32 4294967294, %s1343_s26   ;;  %s1343_s26 = sphi %s1393_s26, %s1778_s26   ;;  %s1339_s25 = sphi %s1391_s25, %s1777_s25   ;;  %s1335_s24 = sphi %s1389_s24, %s1776_s24   ;;  %s1331_s23 = sphi %s1387_s23, %s1775_s23  }
   0xa   : > { %p46_p0 = scmp.ne.s32.totalorder %s1335_s24, %s1331_s23  ;;  %p47_p1 = scmp.eq.s32.totalorder %s1408_s4, 0 }
   0xb   : > { %p154_p2 = scmp.eq.s32.totalorder %s1408_s4, 1  ;;  %p160_p3 = scmp.eq.s32.totalorder %s1014_s27, 1 }
   0xc   : > { %p1417_p4 = por %p47_p1, %p46_p0  ;;  %p1015_p5 = scmp.ge.s32.totalorder %s1343_s26, 1 }
   0xd   : > { %p1422_p6 = por %p160_p3, %p46_p0  ;;  %p193_p7 = scmp.lt.s32.totalorder %s1343_s26, 3 }
   0xe   : > { %s204_s8 = sshll.u32 %s1752_s1, 4  ;;  %s1345_s10 = smov [#allocation6]   ;;  %s205_s8 = int_to_ptr.hbm [resolvable:$true] %s204_s8 }
   0xf   : > { %p1430_p8 = pnand %p1015_p5, %p193_p7  ;;  %s206_s11 = sshll.u32 %s1345_s10, 4  ;;  %s207_s11 = int_to_ptr.vmem [resolvable:$true] %s206_s11 }
  0x10   : > { %s1440_s12 = sadd.s32 1, %s1343_s26   ;;  %s1758_s13 = smov 64  }
  0x11   : > { %p1123_p9 = pneg %p1430_p8  ;;  %s1347_s14 = smov 4  }
  0x12   : > { %s30_s15 = ssub.s32 %s1343_s26, %s1440_s12  ;;  %s33_s16 = sadd.s32 1, %s1339_s25 }
  0x13   : > { %p1124_p10 = pnand %p1123_p9, %p47_p1  ;;  %p31_p12 = scmp.eq.s32.totalorder %s30_s15, 0 }
  0x14   : > { %p40_p13 = scmp.ne.s32.totalorder %s1339_s25, %s1335_s24  ;;  %p41_p0 = scmp.eq.s32.totalorder %s1343_s26, 0 }
  0x15   : > { %1126 = dma.hbm_to_vmem [thread:$0]  (!%p1124_p10), %s205_s8, 1024, %s207_s11, [#allocation7], %s1758_s13, %s1758_s13, %s1347_s14  }
  0x16   : > { %s1452_s17 = scalar_select %p31_p12, %s1339_s25, %s33_s16  }
  0x17   : > { %p1456_p3 = por %p154_p2, %p40_p13  ;;  %p1136_p5 = scmp.lt.s32.totalorder %s1343_s26, 2 }
  0x18   : > { %s229_s19 = sand.u32 1, %s1339_s25   ;;  %s1078_s20 = sshll.u32 %s1343_s26, 5 }
  0x19   : > { %p42_p7 = por %p41_p0, %p40_p13  ;;  %s1018_s21 = sshll.u32 %s229_s19, 5 }
  0x1a   : > { %s238_s30 = scalar_lea.hbm %s1751_s0, %s1078_s20  ;;  %s233_s8 = scalar_lea.vmem [#allocation3], %s1018_s21 }
  0x1b   : > { %s239_s7 = sshll.u32 %s238_s30, 4  ;;  %s241_s10 = sshll.u32 %s233_s8, 4  ;;  %s240_s7 = int_to_ptr.hbm [resolvable:$true] %s239_s7  ;;  %s242_s10 = int_to_ptr.vmem [resolvable:$true] %s241_s10 }
  0x1c   : > { %p1466_p9 = pnand %p1136_p5, %p42_p7  ;;  %s230_s15 = scalar_lea.sflag [#allocation4], %s229_s19 }
  0x1d   : > { %s1243_s16 = sshra.s32 %s240_s7, 4  ;;  %s1250_s21 = scalar_lea.hbm %s1751_s0, 64  ;;  %s1244_s16 = int_to_ptr.hbm [resolvable:$true] %s1243_s16 }
  0x1e   : > { %s1245_s13 = scalar_lea.hbm %s1244_s16, 32  ;;  %p1247_p10 = pneg %p1466_p9 }
  0x1f   : > { %p1246_p2 = scmp.ne.s32.totalorder %s1244_s16, %s1245_s13  ;;  %p1251_p0 = scmp.lt.s32.totalorder %s1244_s16, %s1751_s0 }
  0x20   : > { %p1252_p5 = scmp.lt.s32.totalorder %s1250_s21, %s1245_s13 }
  0x21   : > { %p1248_p12 = pnand %p1247_p10, %p1246_p2 }
  0x22   : > { %p1253_p7 = por %p1252_p5, %p1251_p0 }
  0x23   : > { %p1249_p13 = pneg %p1248_p12 }
  0x25   : > { %p1254_p11 = pnand %p1253_p7, %p1249_p13 }
  0x27   : > { %1257 = shalt.err (!%p1254_p11)
}
  0x28   : > { %s1766_s19 = smov 64   ;;  %253 = sbr.rel (%p1430_p8) target bundleno = 932 (0x3a4), region = 40 }
  0x29   : > { %1130 = dma.hbm_to_vmem [thread:$0]  (!%p1466_p9), %s240_s7, 512, %s242_s10, %s230_s15, %s1766_s19, %s1766_s19, %s1347_s14  }
  0x2a   : > { %s1486_s8 = sand.u32 (!%p1430_p8), 1, %s1335_s24  }
  0x2b   : > { %s1022_s16 = sshll.u32 (!%p1430_p8), %s1486_s8, 5  ;;  %s256_s13 = scalar_lea.sflag (!%p1430_p8), [#allocation4], %s1486_s8 }
  0x2c   : > { %s1490_s20 = scalar_lea.vmem (!%p1430_p8), [#allocation3], %s1022_s16 }
  0x2d   : > { %1318 = dma.done.wait (%p1417_p4), %s256_s13, 512  }
  0x2e   : > { %1320 = vsyncadd (%p1417_p4), %s256_s13, 4294966784 }
  0x2f   : > { %1322 = dma.done.wait (%p47_p1), [#allocation7], 1024  }
  0x30   : > { %1324 = vsyncadd (%p47_p1), [#allocation7], 4294966272  ;;  %v1090_v1 = vld [vmem:[#allocation6 + $0x38] sm:$0xff]  ;;  %v1089_v2 = vld [vmem:[#allocation6 + $0x30] sm:$0xff]  ;;  %v1348_v14 = vmov 0   ;;  %v491_v55 = vlaneseq  ;;  %vm501_vm0 = vcmask 1041409  }
  0x31   : > { %403 = vmatpush.bf16.msra.mxu0 %v1090_v1  ;;  %1091 = vmatpush.bf16.msra.mxu1 %v1090_v1  ;;  %v1088_v3 = vld [vmem:[#allocation6 + $0x28] sm:$0xff]  ;;  %v1087_v4 = vld [vmem:[#allocation6 + $0x20] sm:$0xff]  ;;  %v1086_v5 = vld [vmem:[#allocation6 + $0x18] sm:$0xff]  ;;  %vm503_vm1 = vcmask 1042434   ;;  %vm505_vm2 = vcmask 1043459   ;;  %vm507_vm3 = vcmask 1044484  }
  0x32   : > { %1092 = vmatpush.bf16.msra.mxu2 %v1090_v1  ;;  %1093 = vmatpush.bf16.msra.mxu3 %v1090_v1  ;;  %v1085_v6 = vld [vmem:[#allocation6 + $0x10] sm:$0xff]  ;;  %v1084_v7 = vld [vmem:[#allocation6 + $0x8] sm:$0xff]  ;;  %v1083_v8 = vld [vmem:[#allocation6] sm:$0xff]  ;;  %v1510_v56 = vand.u32 127, %v491_v55  ;;  %vm509_vm4 = vcmask 1045509   ;;  %vm511_vm5 = vcmask 1046534  }
  0x33   : > { %v1079_v9 = vld [vmem:[%s1490_s20] sm:$0xff]  ;;  %v1080_v10 = vld [vmem:[%s1490_s20 + $0x8] sm:$0xff]  ;;  %v1081_v11 = vld [vmem:[%s1490_s20 + $0x10] sm:$0xff]  ;;  %1175 = vset.pattern.permute.xlu1 %v1348_v14  ;;  %1177 = vset.pattern.permute.xlu2 %v1348_v14  ;;  %vm1760_vm6 = vcmask 1047559   ;;  %vm1759_vm7 = vcmask 64512   ;;  %p299_p1 = scmp.lt.s32.totalorder %s1408_s4, 1 }
  0x34   : > { %v1082_v12 = vld [vmem:[%s1490_s20 + $0x18] sm:$0xff]  ;;  %1176 = vset.pattern.permute.xlu0 %v1348_v14  ;;  %s1024_s27 = sshll.u32 %s1486_s8, 3  ;;  %s1075_s30 = sshll.u32 %s1408_s4, 3 }
  0x35   : > { %404 = vmatpush.bf16.msra.mxu0 %v1089_v2  ;;  %1094 = vmatpush.bf16.msra.mxu1 %v1089_v2  ;;  %v1178_v13 = vld [vmem:[%s1753_s2] ss:$0 sm:$0xff]  ;;  %s300_s10 = scalar_select %p299_p1, %s1408_s4, 1 }
  0x36   : > { %1095 = vmatpush.bf16.msra.mxu2 %v1089_v2  ;;  %1096 = vmatpush.bf16.msra.mxu3 %v1089_v2  ;;  %v1179_v19 = vld [vmem:[%s1754_s3] ss:$0 sm:$0xff]  ;;  %s902_s13 = scalar_lea.hbm %s1756_s5, %s1075_s30  ;;  %s291_s4 = scalar_lea.vmem [#allocation8], %s1024_s27 }
  0x37   : > { %v1180_v47 = vld [vmem:[#allocation2] ss:$0 sm:$0xff]  ;;  %s1025_s11 = sshll.u32 %s300_s10, 3  ;;  %s906_s28 = sshll.u32 %s902_s13, 4  ;;  %s907_s28 = int_to_ptr.hbm [resolvable:$true] %s906_s28 }
  0x38   : > { %s302_s21 = scalar_lea.vmem %s1757_s6, %s1025_s11  ;;  %s888_s9 = scalar_lea.sflag [#allocation5], %s1486_s8 }
  0x39   : > { %405 = vmatpush.bf16.msra.mxu0 %v1088_v3  ;;  %1097 = vmatpush.bf16.msra.mxu1 %v1088_v3  ;;  %s1287_s14 = sshra.s32 %s907_s28, 4  ;;  %s1293_s15 = scalar_lea.hbm %s1756_s5, 16  ;;  %s1288_s14 = int_to_ptr.hbm [resolvable:$true] %s1287_s14 }
  0x3a   : > { %1098 = vmatpush.bf16.msra.mxu2 %v1088_v3  ;;  %1099 = vmatpush.bf16.msra.mxu3 %v1088_v3  ;;  %s1289_s7 = scalar_lea.hbm %s1288_s14, 8  ;;  %p1294_p9 = scmp.lt.s32.totalorder %s1288_s14, %s1756_s5 }
  0x3b   : > { %p1290_p4 = scmp.ne.s32.totalorder %s1288_s14, %s1289_s7  ;;  %p1295_p2 = scmp.lt.s32.totalorder %s1293_s15, %s1289_s7 }
  0x3d   : > { %406 = vmatpush.bf16.msra.mxu0 %v1087_v4  ;;  %1100 = vmatpush.bf16.msra.mxu1 %v1087_v4  ;;  %p1291_p8 = pnand %p1290_p4, %p1456_p3  ;;  %p1296_p10 = por %p1295_p2, %p1294_p9 }
  0x3e   : > { %1101 = vmatpush.bf16.msra.mxu2 %v1087_v4  ;;  %1102 = vmatpush.bf16.msra.mxu3 %v1087_v4 }
  0x3f   : > { %p1292_p11 = pneg %p1291_p8 }
  0x41   : > { %407 = vmatpush.bf16.msra.mxu0 %v1086_v5  ;;  %1103 = vmatpush.bf16.msra.mxu1 %v1086_v5  ;;  %p1297_p12 = pnand %p1296_p10, %p1292_p11 }
  0x42   : > { %1104 = vmatpush.bf16.msra.mxu2 %v1086_v5  ;;  %1105 = vmatpush.bf16.msra.mxu3 %v1086_v5 }
  0x45   : > { %408 = vmatpush.bf16.msra.mxu0 %v1085_v6  ;;  %1106 = vmatpush.bf16.msra.mxu1 %v1085_v6 }
  0x46   : > { %1107 = vmatpush.bf16.msra.mxu2 %v1085_v6  ;;  %1108 = vmatpush.bf16.msra.mxu3 %v1085_v6 }
  0x49   : > { %409 = vmatpush.bf16.msra.mxu0 %v1084_v7  ;;  %1109 = vmatpush.bf16.msra.mxu1 %v1084_v7 }
  0x4a   : > { %1110 = vmatpush.bf16.msra.mxu2 %v1084_v7  ;;  %1111 = vmatpush.bf16.msra.mxu3 %v1084_v7 }
  0x4d   : > { %410 = vmatpush.bf16.msra.mxu0 %v1083_v8  ;;  %1112 = vmatpush.bf16.msra.mxu1 %v1083_v8 }
  0x4e   : > { %1113 = vmatpush.bf16.msra.mxu2 %v1083_v8  ;;  %1114 = vmatpush.bf16.msra.mxu3 %v1083_v8 }
  0x50   : > { %411 = vmatmul.bf16.vlgmr.msra.gmra.mxu0 %v1079_v9  ;;  %416 = vmatmul.bf16.vlgmr.msra.gmra.mxu1 %v1080_v10 }
  0x51   : > { %421 = vmatmul.bf16.vlgmr.msra.gmra.mxu2 %v1081_v11  ;;  %426 = vmatmul.bf16.vlgmr.msra.gmra.mxu3 %v1082_v12 }
  0xcd   : > { %v412_v15 = vpop.f32.mrf.mxu0  ;;  %v417_v16 = vpop.f32.mrf.mxu1 }
  0xce   : > { %v413_v17 = vadd.f32 %v1178_v13, %v412_v15  ;;  %v418_v18 = vadd.f32 %v1178_v13, %v417_v16 }
  0xd0   : > { %v432_v20 = vmax.f32 %v413_v17, 0.0  ;;  %v434_v21 = vmax.f32 %v418_v18, 0.0 }
  0xd2   : > { %v446_v22 = vmul.f32 %v1179_v19, %v434_v21  ;;  %v444_v23 = vmul.f32 %v1179_v19, %v432_v20 }
  0xd4   : > { %v422_v24 = vpop.f32.mrf.mxu2  ;;  %456 = vadd.xlane.f32.xlu1 %v446_v22  ;;  %452 = vadd.xlane.f32.xlu0 %v444_v23  ;;  %v427_v27 = vpop.f32.mrf.mxu3 }
  0xd5   : > { %v423_v25 = vadd.f32 %v1178_v13, %v422_v24  ;;  %v414_v26 = vpop.f32.mrf.mxu0  ;;  %v419_v29 = vpop.f32.mrf.mxu1  ;;  %v428_v39 = vadd.f32 %v1178_v13, %v427_v27 }
  0xd6   : > { %v415_v28 = vadd.f32 %v1178_v13, %v414_v26  ;;  %v420_v32 = vadd.f32 %v1178_v13, %v419_v29 }
  0xd7   : > { %v436_v30 = vmax.f32 %v423_v25, 0.0  ;;  %v438_v44 = vmax.f32 %v428_v39, 0.0 }
  0xd8   : > { %v433_v31 = vmax.f32 %v415_v28, 0.0  ;;  %v435_v36 = vmax.f32 %v420_v32, 0.0 }
  0xd9   : > { %v448_v33 = vmul.f32 %v1179_v19, %v436_v30  ;;  %v450_v46 = vmul.f32 %v1179_v19, %v438_v44 }
  0xda   : > { %v445_v34 = vmul.f32 %v1179_v19, %v433_v31  ;;  %v447_v41 = vmul.f32 %v1179_v19, %v435_v36 }
  0xdb   : > { %460 = vadd.xlane.f32.xlu2 %v448_v33 }
  0xdc   : > { %v424_v35 = vpop.f32.mrf.mxu2  ;;  %454 = vadd.xlane.f32.xlu0 %v445_v34  ;;  %v429_v40 = vpop.f32.mrf.mxu3 }
  0xdd   : > { %v425_v37 = vadd.f32 %v1178_v13, %v424_v35  ;;  %v430_v42 = vadd.f32 %v1178_v13, %v429_v40 }
  0xdf   : > { %v437_v38 = vmax.f32 %v425_v37, 0.0  ;;  %v439_v45 = vmax.f32 %v430_v42, 0.0 }
  0xe1   : > { %v449_v43 = vmul.f32 %v1179_v19, %v437_v38  ;;  %v451_v48 = vmul.f32 %v1179_v19, %v439_v45 }
  0xe3   : > { %458 = vadd.xlane.f32.xlu2 %v447_v41 }
  0xe4   : > { %462 = vadd.xlane.f32.xlu0 %v449_v43 }
  0xeb   : > { %464 = vadd.xlane.f32.xlu2 %v450_v46 }
  0xec   : > { %466 = vadd.xlane.f32.xlu0 %v451_v48 }
  0xed   : > { %472 = vperm.xlu1 %1175, %v1180_v47  }
 0x147   : > { %v453_v49 = vpop.xlane.xlu0 %452  ;;  %v457_v52 = vpop.xlane.xlu1 %456 }
 0x14e   : > { %v461_v50 = vpop.xlane.xlu2 %460 }
 0x14f   : > { %v455_v51 = vpop.xlane.xlu0 %454 }
 0x156   : > { %v459_v54 = vpop.xlane.xlu2 %458 }
 0x157   : > { %v463_v53 = vpop.xlane.xlu0 %462 }
 0x15e   : > { %v465_v0 = vpop.xlane.xlu2 %464 }
 0x15f   : > { %v473_v57 = vpop.permute.xlu1 %472  ;;  %v467_v61 = vpop.xlane.xlu0 %466 }
 0x160   : > { %v475_v58 = vadd.f32 %v473_v57, %v453_v49  ;;  %v476_v59 = vadd.f32 %v473_v57, %v455_v51  ;;  %v477_v60 = vadd.f32 %v473_v57, %v457_v52  ;;  %v478_v62 = vadd.f32 %v473_v57, %v459_v54 }
 0x161   : > { %v479_v63 = vadd.f32 %v473_v57, %v461_v50  ;;  %v480_v1 = vadd.f32 %v473_v57, %v463_v53  ;;  %v481_v5 = vadd.f32 %v473_v57, %v465_v0  ;;  %v482_v6 = vadd.f32 %v473_v57, %v467_v61 }
 0x162   : > { %v493_v2 = vperm.slane %v475_v58, %v1510_v56  ;;  %v494_v3 = vperm.slane %v476_v59, %v1510_v56  ;;  %v495_v4 = vperm.slane %v477_v60, %v1510_v56  ;;  %v496_v7 = vperm.slane %v478_v62, %v1510_v56 }
 0x163   : > { %v497_v9 = vperm.slane %v479_v63, %v1510_v56  ;;  %v498_v11 = vperm.slane %v480_v1, %v1510_v56  ;;  %v499_v13 = vperm.slane %v481_v5, %v1510_v56  ;;  %v500_v15 = vperm.slane %v482_v6, %v1510_v56 }
 0x164   : > { %v502_v8 = vsel %vm501_vm0, %v494_v3, %v493_v2 }
 0x165   : > { %v504_v10 = vsel %vm503_vm1, %v495_v4, %v502_v8 }
 0x166   : > { %v506_v12 = vsel %vm505_vm2, %v496_v7, %v504_v10 }
 0x167   : > { %v508_v14 = vsel %vm507_vm3, %v497_v9, %v506_v12 }
 0x168   : > { %v510_v16 = vsel %vm509_vm4, %v498_v11, %v508_v14 }
 0x169   : > { %v512_v17 = vsel %vm511_vm5, %v499_v13, %v510_v16 }
 0x16a   : > { %v514_v18 = vsel %vm1760_vm6, %v500_v15, %v512_v17 }
 0x16b   : > { %v517_v19 = vsel %vm1759_vm7, %v514_v18, -inf }
 0x16c   : > { %518 = vmax.xlane.f32.xlu2 %v517_v19 }
 0x1df   : > { %v519_v20 = vpop.xlane.xlu2 %518 }
 0x1e0   : > { %v523_v21 = vperm.slane %v519_v20, 2  ;;  %v522_v22 = vperm.slane %v519_v20, 1  ;;  %v521_v23 = vperm.slane %v519_v20, 0  ;;  %v524_v27 = vperm.slane %v519_v20, 3 }
 0x1e1   : > { %v526_v28 = vperm.slane %v519_v20, 5  ;;  %v525_v35 = vperm.slane %v519_v20, 4  ;;  %v528_v37 = vperm.slane %v519_v20, 7  ;;  %v527_v44 = vperm.slane %v519_v20, 6 }
 0x1e2   : > { %v539_v24 = vsub.f32 %v477_v60, %v523_v21  ;;  %v538_v25 = vsub.f32 %v476_v59, %v522_v22  ;;  %v537_v26 = vsub.f32 %v475_v58, %v521_v23  ;;  %v540_v32 = vsub.f32 %v478_v62, %v524_v27 }
 0x1e3   : > { %v542_v33 = vsub.f32 %v480_v1, %v526_v28  ;;  %v541_v41 = vsub.f32 %v479_v63, %v525_v35  ;;  %v544_v42 = vsub.f32 %v482_v6, %v528_v37  ;;  %v543_v48 = vsub.f32 %v481_v5, %v527_v44 }
 0x1e4   : > { %v549_v29 = vmul.f32 1.442695, %v539_v24  ;;  %v547_v30 = vmul.f32 1.442695, %v538_v25  ;;  %v545_v31 = vmul.f32 1.442695, %v537_v26 }
 0x1e5   : > { %v551_v34 = vmul.f32 1.442695, %v540_v32  ;;  %v555_v36 = vmul.f32 1.442695, %v542_v33  ;;  %v553_v43 = vmul.f32 1.442695, %v541_v41 }
 0x1e6   : > { %1181 = vpow2.f32 %v549_v29  ;;  %v559_v45 = vmul.f32 1.442695, %v544_v42  ;;  %v557_v49 = vmul.f32 1.442695, %v543_v48 }
 0x1e7   : > { %1183 = vpow2.f32 %v547_v30 }
 0x1e8   : > { %1185 = vpow2.f32 %v545_v31 }
 0x1e9   : > { %1187 = vpow2.f32 %v551_v34 }
 0x1ea   : > { %1189 = vpow2.f32 %v555_v36 }
 0x1eb   : > { %1191 = vpow2.f32 %v553_v43 }
 0x1ec   : > { %v1528_v38 = vpop.eup %1181  ;;  %1193 = vpow2.f32 %v559_v45 }
 0x1ed   : > { %v1530_v39 = vpop.eup %1183  ;;  %576 = vperm.xlu1 %1175, %v1528_v38   ;;  %1195 = vpow2.f32 %v557_v49 }
 0x1ee   : > { %v1533_v40 = vpop.eup %1185  ;;  %573 = vperm.xlu2 %1177, %v1530_v39  }
 0x1ef   : > { %570 = vperm.xlu0 %1176, %v1533_v40   ;;  %v1537_v46 = vpop.eup %1187 }
 0x1f0   : > { %v1539_v47 = vpop.eup %1189 }
 0x1f1   : > { %v1543_v50 = vpop.eup %1191 }
 0x1f2   : > { %v1545_v51 = vpop.eup %1193 }
 0x1f3   : > { %v1549_v52 = vpop.eup %1195 }
 0x1f5   : > { %579 = vperm.xlu1 %1175, %v1537_v46  }
 0x1f6   : > { %585 = vperm.xlu2 %1177, %v1539_v47  }
 0x1fd   : > { %582 = vperm.xlu1 %1175, %v1543_v50  }
 0x1fe   : > { %591 = vperm.xlu2 %1177, %v1545_v51  }
 0x205   : > { %588 = vperm.xlu1 %1175, %v1549_v52  }
 0x248   : > { %v574_v54 = vpop.permute.xlu2 %573 }
 0x249   : > { %v594_v60 = vperm.slane %v574_v54, %v1510_v56 }
 0x250   : > { %v586_v58 = vpop.permute.xlu2 %585 }
 0x251   : > { %v598_v6 = vperm.slane %v586_v58, %v1510_v56 }
 0x258   : > { %v592_v4 = vpop.permute.xlu2 %591 }
 0x259   : > { %v600_v9 = vperm.slane %v592_v4, %v1510_v56 }
 0x25f   : > { %v577_v53 = vpop.permute.xlu1 %576 }
 0x260   : > { %v595_v62 = vperm.slane %v577_v53, %v1510_v56 }
 0x261   : > { %v571_v57 = vpop.permute.xlu0 %570 }
 0x262   : > { %v593_v59 = vperm.slane %v571_v57, %v1510_v56 }
 0x264   : > { %v601_v63 = vsel %vm501_vm0, %v594_v60, %v593_v59 }
 0x265   : > { %v602_v2 = vsel %vm503_vm1, %v595_v62, %v601_v63 }
 0x267   : > { %v580_v55 = vpop.permute.xlu1 %579 }
 0x268   : > { %v596_v0 = vperm.slane %v580_v55, %v1510_v56 }
 0x26a   : > { %v603_v3 = vsel %vm505_vm2, %v596_v0, %v602_v2 }
 0x26f   : > { %v583_v61 = vpop.permute.xlu1 %582 }
 0x270   : > { %v597_v1 = vperm.slane %v583_v61, %v1510_v56 }
 0x272   : > { %v604_v5 = vsel %vm507_vm3, %v597_v1, %v603_v3 }
 0x273   : > { %v605_v10 = vsel %vm509_vm4, %v598_v6, %v604_v5 }
 0x277   : > { %v589_v7 = vpop.permute.xlu1 %588 }
 0x278   : > { %v599_v8 = vperm.slane %v589_v7, %v1510_v56 }
 0x27a   : > { %v606_v11 = vsel %vm511_vm5, %v599_v8, %v605_v10 }
 0x27b   : > { %v607_v12 = vsel %vm1760_vm6, %v600_v9, %v606_v11 }
 0x27c   : > { %v609_v13 = vsel %vm1759_vm7, %v607_v12, 0.0 }
 0x27d   : > { %610 = vadd.xlane.f32.xlu1 %v609_v13 }
 0x2f0   : > { %v611_v14 = vpop.xlane.xlu1 %610 }
 0x2f1   : > { %v613_v15 = vperm.slane %v611_v14, 0  ;;  %v614_v16 = vperm.slane %v611_v14, 1  ;;  %v1568_v17 = vperm.slane %v611_v14, 2  ;;  %v1570_v18 = vperm.slane %v611_v14, 3 }
 0x2f2   : > { %v1572_v19 = vperm.slane %v611_v14, 4  ;;  %v1574_v20 = vperm.slane %v611_v14, 5  ;;  %v1580_v25 = vperm.slane %v611_v14, 7  ;;  %v1582_v28 = vperm.slane %v611_v14, 6 }
 0x2f3   : > { %1197 = vrcp.f32 %v613_v15  ;;  %v653_v21 = vand.u32 2147483647, %v614_v16  ;;  %v655_v22 = vand.u32 2147483648, %v614_v16  ;;  %v638_v23 = vand.u32 2147483647, %v613_v15 }
 0x2f4   : > { %1199 = vrcp.f32 %v614_v16  ;;  %v640_v26 = vand.u32 2147483648, %v613_v15  ;;  %vm649_vm8 = vweird.f32 %v614_v16  ;;  %vm634_vm10 = vweird.f32 %v613_v15 }
 0x2f5   : > { %1201 = vrcp.f32 %v1568_v17  ;;  %vm1586_vm9 = vcmp.eq.f32.partialorder %v653_v21, 8.507059e+37  ;;  %v656_v34 = vor.u32 1.1754944e-38, %v655_v22  ;;  %vm1592_vm11 = vcmp.eq.f32.partialorder %v638_v23, 8.507059e+37 }
 0x2f6   : > { %1203 = vrcp.f32 %v1570_v18  ;;  %v641_v43 = vor.u32 1.1754944e-38, %v640_v26  ;;  %v685_v59 = vand.u32 2147483648, %v1570_v18  ;;  %v670_v61 = vand.u32 2147483648, %v1568_v17 }
 0x2f7   : > { %1205 = vrcp.f32 %v1572_v19  ;;  %v668_v10 = vand.u32 2147483647, %v1568_v17  ;;  %v683_v12 = vand.u32 2147483647, %v1570_v18  ;;  %v715_v22 = vand.u32 2147483648, %v1574_v20 }
 0x2f8   : > { %1207 = vrcp.f32 %v1574_v20  ;;  %v698_v32 = vand.u32 2147483647, %v1572_v19 }
 0x2f9   : > { %v1198_v24 = vpop.eup %1197  ;;  %1209 = vrcp.f32 %v1580_v25 }
 0x2fa   : > { %v1200_v27 = vpop.eup %1199  ;;  %v630_v29 = vmul.f32 %v1198_v24, %v613_v15  ;;  %vm635_vm12 = vweird.f32 %v1198_v24  ;;  %1211 = vrcp.f32 %v1582_v28  ;;  %v671_v15 = vor.u32 1.1754944e-38, %v670_v61 }
 0x2fb   : > { %v1584_v30 = vpop.eup %1201  ;;  %v645_v31 = vmul.f32 %v1200_v27, %v614_v16  ;;  %vm650_vm13 = vweird.f32 %v1200_v27  ;;  %vm636_vm14 = vmor %vm634_vm10, %vm635_vm12  ;;  %vm679_vm10 = vweird.f32 %v1570_v18  ;;  %vm684_vm12 = vcmp.eq.f32.partialorder %v683_v12, 8.507059e+37 }
 0x2fc   : > { %v1590_v33 = vpop.eup %1203  ;;  %v631_v35 = vsub.f32 1.0, %v630_v29  ;;  %v660_v37 = vmul.f32 %v1584_v30, %v1568_v17  ;;  %vm665_vm15 = vweird.f32 %v1584_v30  ;;  %vm651_vm7 = vmor %vm649_vm8, %vm650_vm13  ;;  %vm664_vm8 = vweird.f32 %v1568_v17 }
 0x2fd   : > { %v1598_v41 = vpop.eup %1205  ;;  %v646_v42 = vsub.f32 1.0, %v645_v31  ;;  %v675_v44 = vmul.f32 %v1590_v33, %v1570_v18  ;;  %vm680_vm6 = vweird.f32 %v1590_v33  ;;  %v686_v18 = vor.u32 1.1754944e-38, %v685_v59 }
 0x2fe   : > { %v1603_v45 = vpop.eup %1207  ;;  %v632_v48 = vmul.f32 %v1198_v24, %v631_v35  ;;  %v661_v49 = vsub.f32 1.0, %v660_v37  ;;  %v690_v53 = vmul.f32 %v1598_v41, %v1572_v19  ;;  %v700_v29 = vand.u32 2147483648, %v1572_v19 }
 0x2ff   : > { %v647_v54 = vmul.f32 %v1200_v27, %v646_v42  ;;  %v676_v55 = vsub.f32 1.0, %v675_v44  ;;  %v705_v57 = vmul.f32 %v1603_v45, %v1574_v20  ;;  %v1619_v3 = vpop.eup %1209  ;;  %vm710_vm13 = vweird.f32 %v1603_v45 }
 0x300   : > { %v633_v58 = vadd.f32 %v1198_v24, %v632_v48  ;;  %v662_v60 = vmul.f32 %v1584_v30, %v661_v49  ;;  %v691_v2 = vsub.f32 1.0, %v690_v53  ;;  %v1638_v14 = vpop.eup %1211  ;;  %v735_v17 = vmul.f32 %v1619_v3, %v1580_v25 }
 0x301   : > { %v648_v62 = vadd.f32 %v1200_v27, %v647_v54  ;;  %v677_v63 = vmul.f32 %v1590_v33, %v676_v55  ;;  %v706_v7 = vsub.f32 1.0, %v705_v57  ;;  %v720_v26 = vmul.f32 %v1638_v14, %v1582_v28 }
 0x302   : > { %v637_v0 = vsel %vm636_vm14, %v1198_v24, %v633_v58  ;;  %v663_v1 = vadd.f32 %v1584_v30, %v662_v60  ;;  %vm694_vm14 = vweird.f32 %v1572_v19  ;;  %v713_v35 = vand.u32 2147483647, %v1574_v20 }
 0x303   : > { %v652_v4 = vsel %vm651_vm7, %v1200_v27, %v648_v62  ;;  %v642_v5 = vsel %vm1592_vm11, %v641_v43, %v637_v0  ;;  %v678_v6 = vadd.f32 %v1590_v33, %v677_v63  ;;  %vm666_vm7 = vmor %vm664_vm8, %vm665_vm15  ;;  %v707_v16 = vmul.f32 %v1603_v45, %v706_v7  ;;  %v303_v63 = vld [vmem:[%s1490_s20] sm:$0xf]  ;;  %v304_v0 = vld [vmem:[%s1490_s20 + $0x4] sm:$0xff]  }
 0x304   : > { %v657_v8 = vsel %vm1586_vm9, %v656_v34, %v652_v4  ;;  %v643_v9 = vmul.f32 %v1533_v40, %v642_v5  ;;  %vm681_vm11 = vmor %vm679_vm10, %vm680_vm6  ;;  %v667_v13 = vsel %vm666_vm7, %v1584_v30, %v663_v1  ;;  %v692_v40 = vmul.f32 %v1598_v41, %v691_v2  ;;  %v306_v4 = vld [vmem:[%s1490_s20 + $0xc] sm:$0xff]  }
 0x305   : > { %v658_v11 = vmul.f32 %v1530_v39, %v657_v8  ;;  %v682_v39 = vsel %vm681_vm11, %v1590_v33, %v678_v6  ;;  %vm669_vm9 = vcmp.eq.f32.partialorder %v668_v10, 8.507059e+37  ;;  %vm695_vm6 = vweird.f32 %v1598_v41 }
 0x306   : > { %759 = vperm.xlu0 %1176, %v643_v9   ;;  %v672_v21 = vsel %vm669_vm9, %v671_v15, %v667_v13  ;;  %v687_v23 = vsel %vm684_vm12, %v686_v18, %v682_v39  ;;  %v693_v24 = vadd.f32 %v1598_v41, %v692_v40  ;;  %v708_v27 = vadd.f32 %v1603_v45, %v707_v16  ;;  %vm696_vm8 = vmor %vm694_vm14, %vm695_vm6 }
 0x307   : > { %764 = vperm.xlu2 %1177, %v658_v11   ;;  %v736_v30 = vsub.f32 1.0, %v735_v17  ;;  %v673_v31 = vmul.f32 %v1528_v38, %v672_v21  ;;  %v721_v33 = vsub.f32 1.0, %v720_v26  ;;  %v688_v34 = vmul.f32 %v1537_v46, %v687_v23 }
 0x308   : > { %vm709_vm15 = vweird.f32 %v1574_v20  ;;  %v697_v36 = vsel %vm696_vm8, %v1598_v41, %v693_v24  ;;  %v701_v42 = vor.u32 1.1754944e-38, %v700_v29  ;;  %v716_v43 = vor.u32 1.1754944e-38, %v715_v22 }
 0x309   : > { %vm711_vm10 = vmor %vm709_vm15, %vm710_vm13  ;;  %v722_v37 = vmul.f32 %v1638_v14, %v721_v33  ;;  %v737_v19 = vmul.f32 %v1619_v3, %v736_v30  ;;  %vm699_vm7 = vcmp.eq.f32.partialorder %v698_v32, 8.507059e+37  ;;  %vm714_vm11 = vcmp.eq.f32.partialorder %v713_v35, 8.507059e+37 }
 0x30a   : > { %v712_v38 = vsel %vm711_vm10, %v1603_v45, %v708_v27  ;;  %v702_v46 = vsel %vm699_vm7, %v701_v42, %v697_v36  ;;  %vm725_vm9 = vweird.f32 %v1638_v14  ;;  %vm740_vm12 = vweird.f32 %v1619_v3 }
 0x30b   : > { %v717_v44 = vsel %vm714_vm11, %v716_v43, %v712_v38  ;;  %v723_v20 = vadd.f32 %v1638_v14, %v722_v37  ;;  %v738_v48 = vadd.f32 %v1619_v3, %v737_v19  ;;  %v730_v41 = vand.u32 2147483648, %v1582_v28 }
 0x30c   : > { %v703_v45 = vmul.f32 %v1543_v50, %v702_v46  ;;  %v745_v49 = vand.u32 2147483648, %v1580_v25  ;;  %vm724_vm6 = vweird.f32 %v1582_v28  ;;  %v728_v53 = vand.u32 2147483647, %v1582_v28 }
 0x30d   : > { %v718_v54 = vmul.f32 %v1539_v47, %v717_v44  ;;  %vm739_vm13 = vweird.f32 %v1580_v25  ;;  %v743_v55 = vand.u32 2147483647, %v1580_v25  ;;  %vm726_vm14 = vmor %vm724_vm6, %vm725_vm9  ;;  %v731_v58 = vor.u32 1.1754944e-38, %v730_v41 }
 0x30e   : > { %769 = vperm.xlu0 %1176, %v673_v31   ;;  %vm741_vm15 = vmor %vm739_vm13, %vm740_vm12  ;;  %v727_v57 = vsel %vm726_vm14, %v1638_v14, %v723_v20  ;;  %v746_v59 = vor.u32 1.1754944e-38, %v745_v49  ;;  %vm729_vm8 = vcmp.eq.f32.partialorder %v728_v53, 8.507059e+37  ;;  %v749_v1 = vunpack.c.l.bf16 %v303_v63 }
 0x30f   : > { %774 = vperm.xlu2 %1177, %v688_v34   ;;  %v742_v50 = vsel %vm741_vm15, %v1619_v3, %v738_v48  ;;  %vm744_vm10 = vcmp.eq.f32.partialorder %v743_v55, 8.507059e+37  ;;  %v732_v47 = vsel %vm729_vm8, %v731_v58, %v727_v57  ;;  %v750_v2 = vunpack.c.l.bf16 %v304_v0 }
 0x310   : > { %v747_v28 = vsel %vm744_vm10, %v746_v59, %v742_v50  ;;  %v733_v60 = vmul.f32 %v1549_v52, %v732_v47  ;;  %v752_v8 = vunpack.c.l.bf16 %v306_v4  ;;  %v308_v52 = vld [vmem:[%s1490_s20 + $0x14] sm:$0xff]   ;;  %v751_v9 = vunpack.c.h.bf16 %v304_v0 }
 0x311   : > { %v748_v25 = vmul.f32 %v1545_v51, %v747_v28  ;;  %v310_v51 = vld [vmem:[%s1490_s20 + $0x1c] sm:$0xf]  ;;  %v754_v13 = vunpack.c.l.bf16 %v308_v52  ;;  %v753_v24 = vunpack.c.h.bf16 %v306_v4  ;;  %vm1771_vm7 = vcmask 1047559   ;;  %s904_s20 = sshll.u32 %s291_s4, 4  ;;  %s905_s20 = int_to_ptr.vmem [resolvable:$true] %s904_s20 }
 0x312   : > { %v756_v39 = vunpack.c.l.bf16 %v310_v51  ;;  %vm1772_vm11 = vcmask 64512  }
 0x316   : > { %779 = vperm.xlu0 %1176, %v703_v45  }
 0x317   : > { %784 = vperm.xlu2 %1177, %v718_v54   ;;  %v755_v54 = vunpack.c.h.bf16 %v308_v52 }
 0x31e   : > { %789 = vperm.xlu0 %1176, %v733_v60  }
 0x31f   : > { %794 = vperm.xlu2 %1177, %v748_v25  }
 0x361   : > { %v765_v61 = vpop.permute.xlu2 %764 }
 0x362   : > { %v798_v7 = vmul.f32 %v765_v61, %v750_v2  ;;  %v871_v33 = vperm.slane %v765_v61, %v1510_v56 }
 0x364   : > { %v811_v11 = vrot.slane %v798_v7, 4 }
 0x366   : > { %v812_v18 = vadd.f32 %v811_v11, %v798_v7 }
 0x368   : > { %v813_v32 = vrot.slane %v812_v18, 2 }
 0x369   : > { %v775_v62 = vpop.permute.xlu2 %774 }
 0x36a   : > { %v800_v12 = vmul.f32 %v775_v62, %v752_v8  ;;  %v814_v48 = vadd.f32 %v813_v32, %v812_v18  ;;  %v873_v45 = vperm.slane %v775_v62, %v1510_v56 }
 0x36c   : > { %v823_v21 = vrot.slane %v800_v12, 4  ;;  %v815_v28 = vrot.slane %v814_v48, 1 }
 0x36e   : > { %v824_v34 = vadd.f32 %v823_v21, %v800_v12 }
 0x370   : > { %v825_v41 = vrot.slane %v824_v34, 2 }
 0x371   : > { %v1681_v5 = vpop.permute.xlu2 %784 }
 0x372   : > { %v802_v22 = vmul.f32 %v1681_v5, %v754_v13  ;;  %v826_v60 = vadd.f32 %v825_v41, %v824_v34  ;;  %v875_v61 = vperm.slane %v1681_v5, %v1510_v56 }
 0x374   : > { %v835_v35 = vrot.slane %v802_v22, 4 }
 0x376   : > { %v836_v49 = vadd.f32 %v835_v35, %v802_v22 }
 0x378   : > { %v760_v3 = vpop.permute.xlu0 %759  ;;  %v837_v25 = vrot.slane %v836_v49, 2 }
 0x379   : > { %v797_v6 = vmul.f32 %v760_v3, %v749_v1  ;;  %v795_v16 = vpop.permute.xlu2 %794  ;;  %v870_v29 = vperm.slane %v760_v3, %v1510_v56 }
 0x37a   : > { %v804_v26 = vmul.f32 %v795_v16, %v756_v39  ;;  %v877_v3 = vperm.slane %v795_v16, %v1510_v56  ;;  %v838_v51 = vadd.f32 %v837_v25, %v836_v49 }
 0x37b   : > { %v805_v10 = vrot.slane %v797_v6, 4  ;;  %v878_v19 = vsel %vm501_vm0, %v871_v33, %v870_v29 }
 0x37c   : > { %v847_v38 = vrot.slane %v804_v26, 4  ;;  %v839_v16 = vrot.slane %v838_v51, 1 }
 0x37d   : > { %v806_v15 = vadd.f32 %v805_v10, %v797_v6  ;;  %v827_v10 = vrot.slane %v826_v60, 1 }
 0x37e   : > { %v848_v55 = vadd.f32 %v847_v38, %v804_v26 }
 0x37f   : > { %v807_v27 = vrot.slane %v806_v15, 2 }
 0x380   : > { %v770_v40 = vpop.permute.xlu0 %769  ;;  %v849_v2 = vrot.slane %v848_v55, 2 }
 0x381   : > { %v799_v14 = vmul.f32 %v770_v40, %v751_v9  ;;  %v872_v31 = vperm.slane %v770_v40, %v1510_v56  ;;  %v808_v42 = vadd.f32 %v807_v27, %v806_v15  ;;  %v816_v9 = vadd.f32 %v815_v28, %v814_v48 }
 0x382   : > { %v850_v12 = vadd.f32 %v849_v2, %v848_v55  ;;  %v828_v15 = vadd.f32 %v827_v10, %v826_v60 }
 0x383   : > { %v817_v17 = vrot.slane %v799_v14, 4  ;;  %v879_v46 = vsel %vm503_vm1, %v872_v31, %v878_v19  ;;  %v809_v57 = vrot.slane %v808_v42, 1 }
 0x384   : > { %v880_v50 = vsel %vm505_vm2, %v873_v45, %v879_v46  ;;  %v851_v18 = vrot.slane %v850_v12, 1 }
 0x385   : > { %v818_v23 = vadd.f32 %v817_v17, %v799_v14  ;;  %v810_v4 = vadd.f32 %v809_v57, %v808_v42 }
 0x386   : > { %v852_v27 = vadd.f32 %v851_v18, %v850_v12 }
 0x387   : > { %v819_v30 = vrot.slane %v818_v23, 2  ;;  %v861_v13 = vsel %vm501_vm0, %v816_v9, %v810_v4  ;;  %vm1773_vm0 = vmmov %vm1771_vm7 }
 0x388   : > { %v780_v36 = vpop.permute.xlu0 %779 }
 0x389   : > { %v801_v37 = vmul.f32 %v780_v36, %v753_v24  ;;  %v820_v43 = vadd.f32 %v819_v30, %v818_v23  ;;  %v874_v20 = vperm.slane %v780_v36, %v1510_v56  ;;  %v840_v24 = vadd.f32 %v839_v16, %v838_v51 }
 0x38b   : > { %v829_v44 = vrot.slane %v801_v37, 4  ;;  %v821_v58 = vrot.slane %v820_v43, 1  ;;  %v881_v47 = vsel %vm507_vm3, %v874_v20, %v880_v50 }
 0x38c   : > { %v882_v6 = vsel %vm509_vm4, %v875_v61, %v881_v47 }
 0x38d   : > { %v830_v53 = vadd.f32 %v829_v44, %v801_v37  ;;  %v822_v7 = vadd.f32 %v821_v58, %v820_v43 }
 0x38f   : > { %v831_v59 = vrot.slane %v830_v53, 2  ;;  %v862_v40 = vsel %vm503_vm1, %v822_v7, %v861_v13 }
 0x390   : > { %v790_v63 = vpop.permute.xlu0 %789  ;;  %v863_v21 = vsel %vm505_vm2, %v828_v15, %v862_v40 }
 0x391   : > { %v832_v62 = vadd.f32 %v831_v59, %v830_v53  ;;  %v803_v0 = vmul.f32 %v790_v63, %v755_v54  ;;  %v876_v1 = vperm.slane %v790_v63, %v1510_v56 }
 0x393   : > { %v833_v8 = vrot.slane %v832_v62, 1  ;;  %v841_v5 = vrot.slane %v803_v0, 4  ;;  %v883_v52 = vsel %vm511_vm5, %v876_v1, %v882_v6 }
 0x394   : > { %v884_v11 = vsel %vm1771_vm7, %v877_v3, %v883_v52 }
 0x395   : > { %v842_v56 = vadd.f32 %v841_v5, %v803_v0  ;;  %886 = vst.msk [vmem:[%s302_s21] sm:$0xff] %vm1772_vm11, %v884_v11  ;;  %v834_v14 = vadd.f32 %v833_v8, %v832_v62 }
 0x397   : > { %v843_v39 = vrot.slane %v842_v56, 2  ;;  %v864_v22 = vsel %vm507_vm3, %v834_v14, %v863_v21 }
 0x398   : > { %v865_v29 = vsel %vm509_vm4, %v840_v24, %v864_v22 }
 0x399   : > { %v844_v17 = vadd.f32 %v843_v39, %v842_v56 }
 0x39b   : > { %v845_v23 = vrot.slane %v844_v17, 1 }
 0x39d   : > { %v846_v26 = vadd.f32 %v845_v23, %v844_v17 }
 0x39f   : > { %v866_v30 = vsel %vm511_vm5, %v846_v26, %v865_v29 }
 0x3a0   : > { %v867_v31 = vsel %vm1773_vm0, %v852_v27, %v866_v30 }
 0x3a1   : > { %869 = vst [vmem:[%s291_s4] sm:$0xff] %v867_v31 }
 0x3a2   : > { %1300 = shalt.err (!%p1297_p12)
}
 0x3a3   : > { %1121 = dma.vmem_to_hbm [thread:$0]  (%p1456_p3), %s905_s20, 128, %s907_s28, %s888_s9  }
 0x3a4 PF: > { %s921_s8 = sand.u32 1, %s1331_s23   ;;  %p1774_p13 = scmp.ge.s32.totalorder %s1343_s26, 2 }
 0x3a5   : > { %s922_s27 = scalar_lea.sflag [#allocation5], %s921_s8 }
 0x3a6   : > { %p1132_p0 = pnand %p1774_p13, %p1422_p6 }
 0x3a8   : > { %p1133_p5 = pneg %p1132_p0 }
 0x3aa   : > { %1326 = dma.done.wait (%p1133_p5), %s922_s27, 128  }
 0x3ab   : > { %1328 = vsyncadd (%p1133_p5), %s922_s27, 4294967168  ;;  %p23_p7 = scmp.ge.s32.totalorder %s1440_s12, 4   ;;  %s1775_s23 = smov %s1335_s24 }
 0x3ac   : > { %s1776_s24 = smov %s1339_s25  ;;  %s1777_s25 = smov %s1452_s17 }
 0x3ad   : > { %s1778_s26 = smov %s1440_s12  ;;  %25 = sbr.rel (!%p23_p7) target bundleno = 9 (0x9), region = 101 }
 0x3b2   :  { %935 = vsyncpa [#allocation4], 1 }
 0x3b3   :  { %937 = vsyncpa [#allocation4 + $0x1], 1 }
 0x3b4   :  { %938 = vsyncpa [#allocation7], 1 }
 0x3b5   :  { %939 = vsyncpa [#allocation5], 1 }
 0x3b6   :  { %941 = vsyncpa [#allocation5 + $0x1], 1 }

</bundles_post_ra>
